<compile_context>
chip_gen: v5e
topology: v5e:2x2
jax: 0.10.0
libtpu: 0.0.40
codegen_flags: <defaults>
</compile_context>

<pallas_src>
import functools

import jax
import jax.numpy as jnp
from jax.experimental import pallas as pl
from jax.experimental.pallas import tpu as pltpu


def _cl_loss_kernel(*refs, num_rows, num_pos, inv_t):
    """refs = (row_0 .. row_{R-1}, out, sq_0 .. sq_{R-1}, dot_1 .. dot_{R-1}).

    Grid: 1-D reduction over sublane tiles of the reshaped (S, 128) rows
    (row 0 = anchor pos[0]).  Per-row partial sums are accumulated in (1, 1)
    VMEM scratch refs that persist across grid steps.
    """
    in_refs = refs[:num_rows]
    out_ref = refs[num_rows]
    sq_refs = refs[num_rows + 1: 2 * num_rows + 1]   # |x|^2 per row
    dot_refs = refs[2 * num_rows + 1:]               # <x, anchor>, rows 1..R-1

    k = pl.program_id(0)

    # ---- init accumulators on the first tile --------------------------------
    @pl.when(k == 0)
    def _init():
        for r in sq_refs:
            r[...] = jnp.zeros_like(r)
        for r in dot_refs:
            r[...] = jnp.zeros_like(r)

    # ---- accumulate this tile ------------------------------------------------
    anchor = in_refs[0][...].astype(jnp.float32)                    # (St, 128)
    # anchor . anchor == |anchor|^2 -> no separate dot accumulator for row 0.
    sq_refs[0][...] += jnp.sum(anchor * anchor, keepdims=True)      # (1, 1)
    for i in range(1, num_rows):
        x = in_refs[i][...].astype(jnp.float32)                     # (St, 128)
        dot_refs[i - 1][...] += jnp.sum(x * anchor, keepdims=True)
        sq_refs[i][...] += jnp.sum(x * x, keepdims=True)

    # ---- finalize on the last tile --------------------------------------------
    @pl.when(k == pl.num_programs(0) - 1)
    def _finalize():
        inv_anchor_mag = jax.lax.rsqrt(sq_refs[0][...])             # (1, 1)

        n_val = jnp.zeros((1, 1), jnp.float32)
        for i in range(1, num_pos):                                 # positives vs anchor
            cos = dot_refs[i - 1][...] * jax.lax.rsqrt(sq_refs[i][...]) * inv_anchor_mag
            n_val = n_val + jnp.exp(cos * inv_t)

        d_val = jnp.zeros((1, 1), jnp.float32)
        for i in range(num_pos, num_rows):                          # negatives vs anchor
            cos = dot_refs[i - 1][...] * jax.lax.rsqrt(sq_refs[i][...]) * inv_anchor_mag
            d_val = d_val + jnp.exp(cos * inv_t)

        out_ref[...] = -jnp.log(n_val / (n_val + d_val))


def _pick_sublane_tile(s, max_sublanes):
    """Largest multiple of 8 that divides s and is <= max_sublanes; else full s."""
    if s % 8 != 0:
        return s                       # full-array sublane block is always legal
    best, cand = 8, 8
    while cand <= min(s, max_sublanes):
        if s % cand == 0:
            best = cand
        cand += 8
    return best


def contrastive_loss_pallas(pos_list, neg_list, t=1.0, max_tile_sublanes=1024):
    """pos_list / neg_list: lists of same-sized arrays.  Returns loss of shape (1,)."""
    num_pos = len(pos_list)
    tensors = list(pos_list) + list(neg_list)
    num_rows = len(tensors)
    d = int(tensors[0].size)

    # Reshape each flattened tensor to a lane-dense 2-D slab (no data movement):
    #   * D % 128 == 0 -> (D//128, 128): full (8,128) vregs, contiguous DMAs.
    #   * otherwise    -> (1, D): single full-array block (still legal).
    if d % 128 == 0:
        s, c = d // 128, 128
    else:
        s, c = 1, d
    rows = [jnp.reshape(x, (s, c)) for x in tensors]

    st = _pick_sublane_tile(s, max_tile_sublanes)   # sweepable tile height
    num_tiles = s // st

    kernel = functools.partial(
        _cl_loss_kernel, num_rows=num_rows, num_pos=num_pos, inv_t=1.0 / float(t))

    scratch = [pltpu.VMEM((1, 1), jnp.float32)       # |x|^2 per row, then dots vs anchor
               for _ in range(2 * num_rows - 1)]

    out = pl.pallas_call(
        kernel,
        out_shape=jax.ShapeDtypeStruct((1, 1), jnp.float32),
        grid_spec=pltpu.PrefetchScalarGridSpec(
            num_scalar_prefetch=0,
            grid=(num_tiles,),
            in_specs=[pl.BlockSpec((st, c), lambda k: (k, 0)) for _ in rows],
            out_specs=pl.BlockSpec((1, 1), lambda k: (0, 0)),
            scratch_shapes=scratch),
        compiler_params=pltpu.CompilerParams(
            dimension_semantics=("arbitrary",)),     # the flattened axis is a reduction
    )(*rows)
    return out.reshape(1)


def _reference(pos_list, neg_list, t=1.0):
    def mag(x):
        return jnp.sqrt(jnp.sum(x.astype(jnp.float32) ** 2))

    def cos(x, y):
        x = x.astype(jnp.float32)
        y = y.astype(jnp.float32)
        return jnp.sum(x * y) / (mag(x) * mag(y))

    n = jnp.zeros((1,), jnp.float32)
    d = jnp.zeros((1,), jnp.float32)
    for i in range(1, len(pos_list)):
        n = n + jnp.exp(cos(pos_list[i], pos_list[0]) / t)
    for i in range(len(neg_list)):
        d = d + jnp.exp(cos(pos_list[0], neg_list[i]) / t)
    return -jnp.log(n / (n + d))


if __name__ == "__main__":
    key = jax.random.PRNGKey(0)
    # Small NCHW feature maps: batch=2, channels=4, spatial=16x16 -> D = 2048.
    shape = (2, 4, 16, 16)
    num_pos, num_neg = 3, 4

    keys = jax.random.split(key, num_pos + num_neg)
    pos_list = [jax.random.normal(keys[i], shape, jnp.float32) for i in range(num_pos)]
    neg_list = [
        jax.random.normal(keys[num_pos + i], shape, jnp.float32) for i in range(num_neg)
    ]

    # max_tile_sublanes=8 -> (2048//128)/8 = 2-step reduction grid, exercising
    # the accumulate/finalize pipeline (use the default budget for large maps).
    loss = contrastive_loss_pallas(pos_list, neg_list, t=1.0, max_tile_sublanes=8)
    jax.block_until_ready(loss)

    ref = _reference(pos_list, neg_list, t=1.0)
    assert loss.shape == (1,)
    assert jnp.allclose(loss, ref, rtol=1e-5, atol=1e-5), (loss, ref)

    # Single-tile path (default tile budget) must agree as well.
    loss_single = contrastive_loss_pallas(pos_list, neg_list, t=1.0)
    jax.block_until_ready(loss_single)
    assert jnp.allclose(loss_single, ref, rtol=1e-5, atol=1e-5), (loss_single, ref)

    print("KERNEL_OK")
</pallas_src>

<mosaic_0001>
module attributes {stable_mosaic.version = 11 : i64} {
  func.func @_cl_loss_kernel(%arg0: i32, %arg1: memref<8x128xf32, #tpu.memory_space<vmem>>, %arg2: memref<8x128xf32, #tpu.memory_space<vmem>>, %arg3: memref<8x128xf32, #tpu.memory_space<vmem>>, %arg4: memref<8x128xf32, #tpu.memory_space<vmem>>, %arg5: memref<8x128xf32, #tpu.memory_space<vmem>>, %arg6: memref<8x128xf32, #tpu.memory_space<vmem>>, %arg7: memref<8x128xf32, #tpu.memory_space<vmem>>, %arg8: memref<1x1xf32, #tpu.memory_space<vmem>>, %arg9: memref<1x1xf32, #tpu.memory_space<vmem>>, %arg10: memref<1x1xf32, #tpu.memory_space<vmem>>, %arg11: memref<1x1xf32, #tpu.memory_space<vmem>>, %arg12: memref<1x1xf32, #tpu.memory_space<vmem>>, %arg13: memref<1x1xf32, #tpu.memory_space<vmem>>, %arg14: memref<1x1xf32, #tpu.memory_space<vmem>>, %arg15: memref<1x1xf32, #tpu.memory_space<vmem>>, %arg16: memref<1x1xf32, #tpu.memory_space<vmem>>, %arg17: memref<1x1xf32, #tpu.memory_space<vmem>>, %arg18: memref<1x1xf32, #tpu.memory_space<vmem>>, %arg19: memref<1x1xf32, #tpu.memory_space<vmem>>, %arg20: memref<1x1xf32, #tpu.memory_space<vmem>>, %arg21: memref<1x1xf32, #tpu.memory_space<vmem>>) attributes {dimension_semantics = [#tpu.dimension_semantics<arbitrary>], iteration_bounds = array<i64: 2>, scalar_prefetch = 0 : i64, scratch_operands = 13 : i64, tpu.core_type = #tpu.core_type<tc>, window_params = [{transform_indices = @transform_0, window_bounds = array<i64: 8, 128>}, {transform_indices = @transform_1, window_bounds = array<i64: 8, 128>}, {transform_indices = @transform_2, window_bounds = array<i64: 8, 128>}, {transform_indices = @transform_3, window_bounds = array<i64: 8, 128>}, {transform_indices = @transform_4, window_bounds = array<i64: 8, 128>}, {transform_indices = @transform_5, window_bounds = array<i64: 8, 128>}, {transform_indices = @transform_6, window_bounds = array<i64: 8, 128>}, {pipeline_mode = #tpu.pipeline_mode<synchronous>, transform_indices = @transform_7, window_bounds = array<i64: 1, 1>}]} {
    %c0_i32 = arith.constant 0 : i32
    %0 = arith.cmpi eq, %arg0, %c0_i32 : i32
    %1 = arith.extui %0 : i1 to i32
    %c0_i32_0 = arith.constant 0 : i32
    %2 = arith.cmpi ne, %1, %c0_i32_0 : i32
    scf.if %2 {
      %cst_79 = arith.constant 0.000000e+00 : f32
      %130 = vector.broadcast %cst_79 : f32 to vector<1x1xf32>
      %c0_80 = arith.constant 0 : index
      %c0_81 = arith.constant 0 : index
      %131 = vector.load %arg9[%c0_80, %c0_81] : memref<1x1xf32, #tpu.memory_space<vmem>>, vector<1x1xf32>
      tpu.vector_store %arg9[%c0_80, %c0_81], %130 {strides = array<i32>} : memref<1x1xf32, #tpu.memory_space<vmem>>, vector<1x1xf32>,
      %cst_82 = arith.constant 0.000000e+00 : f32
      %132 = vector.broadcast %cst_82 : f32 to vector<1x1xf32>
      %c0_83 = arith.constant 0 : index
      %c0_84 = arith.constant 0 : index
      %133 = vector.load %arg10[%c0_83, %c0_84] : memref<1x1xf32, #tpu.memory_space<vmem>>, vector<1x1xf32>
      tpu.vector_store %arg10[%c0_83, %c0_84], %132 {strides = array<i32>} : memref<1x1xf32, #tpu.memory_space<vmem>>, vector<1x1xf32>,
      %cst_85 = arith.constant 0.000000e+00 : f32
      %134 = vector.broadcast %cst_85 : f32 to vector<1x1xf32>
      %c0_86 = arith.constant 0 : index
      %c0_87 = arith.constant 0 : index
      %135 = vector.load %arg11[%c0_86, %c0_87] : memref<1x1xf32, #tpu.memory_space<vmem>>, vector<1x1xf32>
      tpu.vector_store %arg11[%c0_86, %c0_87], %134 {strides = array<i32>} : memref<1x1xf32, #tpu.memory_space<vmem>>, vector<1x1xf32>,
      %cst_88 = arith.constant 0.000000e+00 : f32
      %136 = vector.broadcast %cst_88 : f32 to vector<1x1xf32>
      %c0_89 = arith.constant 0 : index
      %c0_90 = arith.constant 0 : index
      %137 = vector.load %arg12[%c0_89, %c0_90] : memref<1x1xf32, #tpu.memory_space<vmem>>, vector<1x1xf32>
      tpu.vector_store %arg12[%c0_89, %c0_90], %136 {strides = array<i32>} : memref<1x1xf32, #tpu.memory_space<vmem>>, vector<1x1xf32>,
      %cst_91 = arith.constant 0.000000e+00 : f32
      %138 = vector.broadcast %cst_91 : f32 to vector<1x1xf32>
      %c0_92 = arith.constant 0 : index
      %c0_93 = arith.constant 0 : index
      %139 = vector.load %arg13[%c0_92, %c0_93] : memref<1x1xf32, #tpu.memory_space<vmem>>, vector<1x1xf32>
      tpu.vector_store %arg13[%c0_92, %c0_93], %138 {strides = array<i32>} : memref<1x1xf32, #tpu.memory_space<vmem>>, vector<1x1xf32>,
      %cst_94 = arith.constant 0.000000e+00 : f32
      %140 = vector.broadcast %cst_94 : f32 to vector<1x1xf32>
      %c0_95 = arith.constant 0 : index
      %c0_96 = arith.constant 0 : index
      %141 = vector.load %arg14[%c0_95, %c0_96] : memref<1x1xf32, #tpu.memory_space<vmem>>, vector<1x1xf32>
      tpu.vector_store %arg14[%c0_95, %c0_96], %140 {strides = array<i32>} : memref<1x1xf32, #tpu.memory_space<vmem>>, vector<1x1xf32>,
      %cst_97 = arith.constant 0.000000e+00 : f32
      %142 = vector.broadcast %cst_97 : f32 to vector<1x1xf32>
      %c0_98 = arith.constant 0 : index
      %c0_99 = arith.constant 0 : index
      %143 = vector.load %arg15[%c0_98, %c0_99] : memref<1x1xf32, #tpu.memory_space<vmem>>, vector<1x1xf32>
      tpu.vector_store %arg15[%c0_98, %c0_99], %142 {strides = array<i32>} : memref<1x1xf32, #tpu.memory_space<vmem>>, vector<1x1xf32>,
      %cst_100 = arith.constant 0.000000e+00 : f32
      %144 = vector.broadcast %cst_100 : f32 to vector<1x1xf32>
      %c0_101 = arith.constant 0 : index
      %c0_102 = arith.constant 0 : index
      %145 = vector.load %arg16[%c0_101, %c0_102] : memref<1x1xf32, #tpu.memory_space<vmem>>, vector<1x1xf32>
      tpu.vector_store %arg16[%c0_101, %c0_102], %144 {strides = array<i32>} : memref<1x1xf32, #tpu.memory_space<vmem>>, vector<1x1xf32>,
      %cst_103 = arith.constant 0.000000e+00 : f32
      %146 = vector.broadcast %cst_103 : f32 to vector<1x1xf32>
      %c0_104 = arith.constant 0 : index
      %c0_105 = arith.constant 0 : index
      %147 = vector.load %arg17[%c0_104, %c0_105] : memref<1x1xf32, #tpu.memory_space<vmem>>, vector<1x1xf32>
      tpu.vector_store %arg17[%c0_104, %c0_105], %146 {strides = array<i32>} : memref<1x1xf32, #tpu.memory_space<vmem>>, vector<1x1xf32>,
      %cst_106 = arith.constant 0.000000e+00 : f32
      %148 = vector.broadcast %cst_106 : f32 to vector<1x1xf32>
      %c0_107 = arith.constant 0 : index
      %c0_108 = arith.constant 0 : index
      %149 = vector.load %arg18[%c0_107, %c0_108] : memref<1x1xf32, #tpu.memory_space<vmem>>, vector<1x1xf32>
      tpu.vector_store %arg18[%c0_107, %c0_108], %148 {strides = array<i32>} : memref<1x1xf32, #tpu.memory_space<vmem>>, vector<1x1xf32>,
      %cst_109 = arith.constant 0.000000e+00 : f32
      %150 = vector.broadcast %cst_109 : f32 to vector<1x1xf32>
      %c0_110 = arith.constant 0 : index
      %c0_111 = arith.constant 0 : index
      %151 = vector.load %arg19[%c0_110, %c0_111] : memref<1x1xf32, #tpu.memory_space<vmem>>, vector<1x1xf32>
      tpu.vector_store %arg19[%c0_110, %c0_111], %150 {strides = array<i32>} : memref<1x1xf32, #tpu.memory_space<vmem>>, vector<1x1xf32>,
      %cst_112 = arith.constant 0.000000e+00 : f32
      %152 = vector.broadcast %cst_112 : f32 to vector<1x1xf32>
      %c0_113 = arith.constant 0 : index
      %c0_114 = arith.constant 0 : index
      %153 = vector.load %arg20[%c0_113, %c0_114] : memref<1x1xf32, #tpu.memory_space<vmem>>, vector<1x1xf32>
      tpu.vector_store %arg20[%c0_113, %c0_114], %152 {strides = array<i32>} : memref<1x1xf32, #tpu.memory_space<vmem>>, vector<1x1xf32>,
      %cst_115 = arith.constant 0.000000e+00 : f32
      %154 = vector.broadcast %cst_115 : f32 to vector<1x1xf32>
      %c0_116 = arith.constant 0 : index
      %c0_117 = arith.constant 0 : index
      %155 = vector.load %arg21[%c0_116, %c0_117] : memref<1x1xf32, #tpu.memory_space<vmem>>, vector<1x1xf32>
      tpu.vector_store %arg21[%c0_116, %c0_117], %154 {strides = array<i32>} : memref<1x1xf32, #tpu.memory_space<vmem>>, vector<1x1xf32>,
    } else {
    }
    %c0 = arith.constant 0 : index
    %c0_1 = arith.constant 0 : index
    %3 = vector.load %arg1[%c0, %c0_1] : memref<8x128xf32, #tpu.memory_space<vmem>>, vector<8x128xf32>
    %c0_2 = arith.constant 0 : index
    %c0_3 = arith.constant 0 : index
    %4 = vector.load %arg9[%c0_2, %c0_3] : memref<1x1xf32, #tpu.memory_space<vmem>>, vector<1x1xf32>
    %5 = arith.mulf %3, %3 : vector<8x128xf32>
    %6 = vector.shape_cast %5 : vector<8x128xf32> to vector<1x8x128xf32>
    %cst = arith.constant dense<0.000000e+00> : vector<1xf32>
    %7 = vector.multi_reduction <add>, %6, %cst [1, 2] : vector<1x8x128xf32> to vector<1xf32>
    %8 = vector.shape_cast %7 : vector<1xf32> to vector<1x1x1xf32>
    %9 = vector.extract %8[0, 0, 0] : f32 from vector<1x1x1xf32>
    %10 = vector.broadcast %9 : f32 to vector<1x1xf32>
    %11 = arith.addf %4, %10 : vector<1x1xf32>
    %c0_4 = arith.constant 0 : index
    %c0_5 = arith.constant 0 : index
    %12 = vector.load %arg9[%c0_4, %c0_5] : memref<1x1xf32, #tpu.memory_space<vmem>>, vector<1x1xf32>
    tpu.vector_store %arg9[%c0_4, %c0_5], %11 {strides = array<i32>} : memref<1x1xf32, #tpu.memory_space<vmem>>, vector<1x1xf32>,
    %c0_6 = arith.constant 0 : index
    %c0_7 = arith.constant 0 : index
    %13 = vector.load %arg2[%c0_6, %c0_7] : memref<8x128xf32, #tpu.memory_space<vmem>>, vector<8x128xf32>
    %c0_8 = arith.constant 0 : index
    %c0_9 = arith.constant 0 : index
    %14 = vector.load %arg16[%c0_8, %c0_9] : memref<1x1xf32, #tpu.memory_space<vmem>>, vector<1x1xf32>
    %15 = arith.mulf %13, %3 : vector<8x128xf32>
    %16 = vector.shape_cast %15 : vector<8x128xf32> to vector<1x8x128xf32>
    %cst_10 = arith.constant dense<0.000000e+00> : vector<1xf32>
    %17 = vector.multi_reduction <add>, %16, %cst_10 [1, 2] : vector<1x8x128xf32> to vector<1xf32>
    %18 = vector.shape_cast %17 : vector<1xf32> to vector<1x1x1xf32>
    %19 = vector.extract %18[0, 0, 0] : f32 from vector<1x1x1xf32>
    %20 = vector.broadcast %19 : f32 to vector<1x1xf32>
    %21 = arith.addf %14, %20 : vector<1x1xf32>
    %c0_11 = arith.constant 0 : index
    %c0_12 = arith.constant 0 : index
    %22 = vector.load %arg16[%c0_11, %c0_12] : memref<1x1xf32, #tpu.memory_space<vmem>>, vector<1x1xf32>
    tpu.vector_store %arg16[%c0_11, %c0_12], %21 {strides = array<i32>} : memref<1x1xf32, #tpu.memory_space<vmem>>, vector<1x1xf32>,
    %c0_13 = arith.constant 0 : index
    %c0_14 = arith.constant 0 : index
    %23 = vector.load %arg10[%c0_13, %c0_14] : memref<1x1xf32, #tpu.memory_space<vmem>>, vector<1x1xf32>
    %24 = arith.mulf %13, %13 : vector<8x128xf32>
    %25 = vector.shape_cast %24 : vector<8x128xf32> to vector<1x8x128xf32>
    %cst_15 = arith.constant dense<0.000000e+00> : vector<1xf32>
    %26 = vector.multi_reduction <add>, %25, %cst_15 [1, 2] : vector<1x8x128xf32> to vector<1xf32>
    %27 = vector.shape_cast %26 : vector<1xf32> to vector<1x1x1xf32>
    %28 = vector.extract %27[0, 0, 0] : f32 from vector<1x1x1xf32>
    %29 = vector.broadcast %28 : f32 to vector<1x1xf32>
    %30 = arith.addf %23, %29 : vector<1x1xf32>
    %c0_16 = arith.constant 0 : index
    %c0_17 = arith.constant 0 : index
    %31 = vector.load %arg10[%c0_16, %c0_17] : memref<1x1xf32, #tpu.memory_space<vmem>>, vector<1x1xf32>
    tpu.vector_store %arg10[%c0_16, %c0_17], %30 {strides = array<i32>} : memref<1x1xf32, #tpu.memory_space<vmem>>, vector<1x1xf32>,
    %c0_18 = arith.constant 0 : index
    %c0_19 = arith.constant 0 : index
    %32 = vector.load %arg3[%c0_18, %c0_19] : memref<8x128xf32, #tpu.memory_space<vmem>>, vector<8x128xf32>
    %c0_20 = arith.constant 0 : index
    %c0_21 = arith.constant 0 : index
    %33 = vector.load %arg17[%c0_20, %c0_21] : memref<1x1xf32, #tpu.memory_space<vmem>>, vector<1x1xf32>
    %34 = arith.mulf %32, %3 : vector<8x128xf32>
    %35 = vector.shape_cast %34 : vector<8x128xf32> to vector<1x8x128xf32>
    %cst_22 = arith.constant dense<0.000000e+00> : vector<1xf32>
    %36 = vector.multi_reduction <add>, %35, %cst_22 [1, 2] : vector<1x8x128xf32> to vector<1xf32>
    %37 = vector.shape_cast %36 : vector<1xf32> to vector<1x1x1xf32>
    %38 = vector.extract %37[0, 0, 0] : f32 from vector<1x1x1xf32>
    %39 = vector.broadcast %38 : f32 to vector<1x1xf32>
    %40 = arith.addf %33, %39 : vector<1x1xf32>
    %c0_23 = arith.constant 0 : index
    %c0_24 = arith.constant 0 : index
    %41 = vector.load %arg17[%c0_23, %c0_24] : memref<1x1xf32, #tpu.memory_space<vmem>>, vector<1x1xf32>
    tpu.vector_store %arg17[%c0_23, %c0_24], %40 {strides = array<i32>} : memref<1x1xf32, #tpu.memory_space<vmem>>, vector<1x1xf32>,
    %c0_25 = arith.constant 0 : index
    %c0_26 = arith.constant 0 : index
    %42 = vector.load %arg11[%c0_25, %c0_26] : memref<1x1xf32, #tpu.memory_space<vmem>>, vector<1x1xf32>
    %43 = arith.mulf %32, %32 : vector<8x128xf32>
    %44 = vector.shape_cast %43 : vector<8x128xf32> to vector<1x8x128xf32>
    %cst_27 = arith.constant dense<0.000000e+00> : vector<1xf32>
    %45 = vector.multi_reduction <add>, %44, %cst_27 [1, 2] : vector<1x8x128xf32> to vector<1xf32>
    %46 = vector.shape_cast %45 : vector<1xf32> to vector<1x1x1xf32>
    %47 = vector.extract %46[0, 0, 0] : f32 from vector<1x1x1xf32>
    %48 = vector.broadcast %47 : f32 to vector<1x1xf32>
    %49 = arith.addf %42, %48 : vector<1x1xf32>
    %c0_28 = arith.constant 0 : index
    %c0_29 = arith.constant 0 : index
    %50 = vector.load %arg11[%c0_28, %c0_29] : memref<1x1xf32, #tpu.memory_space<vmem>>, vector<1x1xf32>
    tpu.vector_store %arg11[%c0_28, %c0_29], %49 {strides = array<i32>} : memref<1x1xf32, #tpu.memory_space<vmem>>, vector<1x1xf32>,
    %c0_30 = arith.constant 0 : index
    %c0_31 = arith.constant 0 : index
    %51 = vector.load %arg4[%c0_30, %c0_31] : memref<8x128xf32, #tpu.memory_space<vmem>>, vector<8x128xf32>
    %c0_32 = arith.constant 0 : index
    %c0_33 = arith.constant 0 : index
    %52 = vector.load %arg18[%c0_32, %c0_33] : memref<1x1xf32, #tpu.memory_space<vmem>>, vector<1x1xf32>
    %53 = arith.mulf %51, %3 : vector<8x128xf32>
    %54 = vector.shape_cast %53 : vector<8x128xf32> to vector<1x8x128xf32>
    %cst_34 = arith.constant dense<0.000000e+00> : vector<1xf32>
    %55 = vector.multi_reduction <add>, %54, %cst_34 [1, 2] : vector<1x8x128xf32> to vector<1xf32>
    %56 = vector.shape_cast %55 : vector<1xf32> to vector<1x1x1xf32>
    %57 = vector.extract %56[0, 0, 0] : f32 from vector<1x1x1xf32>
    %58 = vector.broadcast %57 : f32 to vector<1x1xf32>
    %59 = arith.addf %52, %58 : vector<1x1xf32>
    %c0_35 = arith.constant 0 : index
    %c0_36 = arith.constant 0 : index
    %60 = vector.load %arg18[%c0_35, %c0_36] : memref<1x1xf32, #tpu.memory_space<vmem>>, vector<1x1xf32>
    tpu.vector_store %arg18[%c0_35, %c0_36], %59 {strides = array<i32>} : memref<1x1xf32, #tpu.memory_space<vmem>>, vector<1x1xf32>,
    %c0_37 = arith.constant 0 : index
    %c0_38 = arith.constant 0 : index
    %61 = vector.load %arg12[%c0_37, %c0_38] : memref<1x1xf32, #tpu.memory_space<vmem>>, vector<1x1xf32>
    %62 = arith.mulf %51, %51 : vector<8x128xf32>
    %63 = vector.shape_cast %62 : vector<8x128xf32> to vector<1x8x128xf32>
    %cst_39 = arith.constant dense<0.000000e+00> : vector<1xf32>
    %64 = vector.multi_reduction <add>, %63, %cst_39 [1, 2] : vector<1x8x128xf32> to vector<1xf32>
    %65 = vector.shape_cast %64 : vector<1xf32> to vector<1x1x1xf32>
    %66 = vector.extract %65[0, 0, 0] : f32 from vector<1x1x1xf32>
    %67 = vector.broadcast %66 : f32 to vector<1x1xf32>
    %68 = arith.addf %61, %67 : vector<1x1xf32>
    %c0_40 = arith.constant 0 : index
    %c0_41 = arith.constant 0 : index
    %69 = vector.load %arg12[%c0_40, %c0_41] : memref<1x1xf32, #tpu.memory_space<vmem>>, vector<1x1xf32>
    tpu.vector_store %arg12[%c0_40, %c0_41], %68 {strides = array<i32>} : memref<1x1xf32, #tpu.memory_space<vmem>>, vector<1x1xf32>,
    %c0_42 = arith.constant 0 : index
    %c0_43 = arith.constant 0 : index
    %70 = vector.load %arg5[%c0_42, %c0_43] : memref<8x128xf32, #tpu.memory_space<vmem>>, vector<8x128xf32>
    %c0_44 = arith.constant 0 : index
    %c0_45 = arith.constant 0 : index
    %71 = vector.load %arg19[%c0_44, %c0_45] : memref<1x1xf32, #tpu.memory_space<vmem>>, vector<1x1xf32>
    %72 = arith.mulf %70, %3 : vector<8x128xf32>
    %73 = vector.shape_cast %72 : vector<8x128xf32> to vector<1x8x128xf32>
    %cst_46 = arith.constant dense<0.000000e+00> : vector<1xf32>
    %74 = vector.multi_reduction <add>, %73, %cst_46 [1, 2] : vector<1x8x128xf32> to vector<1xf32>
    %75 = vector.shape_cast %74 : vector<1xf32> to vector<1x1x1xf32>
    %76 = vector.extract %75[0, 0, 0] : f32 from vector<1x1x1xf32>
    %77 = vector.broadcast %76 : f32 to vector<1x1xf32>
    %78 = arith.addf %71, %77 : vector<1x1xf32>
    %c0_47 = arith.constant 0 : index
    %c0_48 = arith.constant 0 : index
    %79 = vector.load %arg19[%c0_47, %c0_48] : memref<1x1xf32, #tpu.memory_space<vmem>>, vector<1x1xf32>
    tpu.vector_store %arg19[%c0_47, %c0_48], %78 {strides = array<i32>} : memref<1x1xf32, #tpu.memory_space<vmem>>, vector<1x1xf32>,
    %c0_49 = arith.constant 0 : index
    %c0_50 = arith.constant 0 : index
    %80 = vector.load %arg13[%c0_49, %c0_50] : memref<1x1xf32, #tpu.memory_space<vmem>>, vector<1x1xf32>
    %81 = arith.mulf %70, %70 : vector<8x128xf32>
    %82 = vector.shape_cast %81 : vector<8x128xf32> to vector<1x8x128xf32>
    %cst_51 = arith.constant dense<0.000000e+00> : vector<1xf32>
    %83 = vector.multi_reduction <add>, %82, %cst_51 [1, 2] : vector<1x8x128xf32> to vector<1xf32>
    %84 = vector.shape_cast %83 : vector<1xf32> to vector<1x1x1xf32>
    %85 = vector.extract %84[0, 0, 0] : f32 from vector<1x1x1xf32>
    %86 = vector.broadcast %85 : f32 to vector<1x1xf32>
    %87 = arith.addf %80, %86 : vector<1x1xf32>
    %c0_52 = arith.constant 0 : index
    %c0_53 = arith.constant 0 : index
    %88 = vector.load %arg13[%c0_52, %c0_53] : memref<1x1xf32, #tpu.memory_space<vmem>>, vector<1x1xf32>
    tpu.vector_store %arg13[%c0_52, %c0_53], %87 {strides = array<i32>} : memref<1x1xf32, #tpu.memory_space<vmem>>, vector<1x1xf32>,
    %c0_54 = arith.constant 0 : index
    %c0_55 = arith.constant 0 : index
    %89 = vector.load %arg6[%c0_54, %c0_55] : memref<8x128xf32, #tpu.memory_space<vmem>>, vector<8x128xf32>
    %c0_56 = arith.constant 0 : index
    %c0_57 = arith.constant 0 : index
    %90 = vector.load %arg20[%c0_56, %c0_57] : memref<1x1xf32, #tpu.memory_space<vmem>>, vector<1x1xf32>
    %91 = arith.mulf %89, %3 : vector<8x128xf32>
    %92 = vector.shape_cast %91 : vector<8x128xf32> to vector<1x8x128xf32>
    %cst_58 = arith.constant dense<0.000000e+00> : vector<1xf32>
    %93 = vector.multi_reduction <add>, %92, %cst_58 [1, 2] : vector<1x8x128xf32> to vector<1xf32>
    %94 = vector.shape_cast %93 : vector<1xf32> to vector<1x1x1xf32>
    %95 = vector.extract %94[0, 0, 0] : f32 from vector<1x1x1xf32>
    %96 = vector.broadcast %95 : f32 to vector<1x1xf32>
    %97 = arith.addf %90, %96 : vector<1x1xf32>
    %c0_59 = arith.constant 0 : index
    %c0_60 = arith.constant 0 : index
    %98 = vector.load %arg20[%c0_59, %c0_60] : memref<1x1xf32, #tpu.memory_space<vmem>>, vector<1x1xf32>
    tpu.vector_store %arg20[%c0_59, %c0_60], %97 {strides = array<i32>} : memref<1x1xf32, #tpu.memory_space<vmem>>, vector<1x1xf32>,
    %c0_61 = arith.constant 0 : index
    %c0_62 = arith.constant 0 : index
    %99 = vector.load %arg14[%c0_61, %c0_62] : memref<1x1xf32, #tpu.memory_space<vmem>>, vector<1x1xf32>
    %100 = arith.mulf %89, %89 : vector<8x128xf32>
    %101 = vector.shape_cast %100 : vector<8x128xf32> to vector<1x8x128xf32>
    %cst_63 = arith.constant dense<0.000000e+00> : vector<1xf32>
    %102 = vector.multi_reduction <add>, %101, %cst_63 [1, 2] : vector<1x8x128xf32> to vector<1xf32>
    %103 = vector.shape_cast %102 : vector<1xf32> to vector<1x1x1xf32>
    %104 = vector.extract %103[0, 0, 0] : f32 from vector<1x1x1xf32>
    %105 = vector.broadcast %104 : f32 to vector<1x1xf32>
    %106 = arith.addf %99, %105 : vector<1x1xf32>
    %c0_64 = arith.constant 0 : index
    %c0_65 = arith.constant 0 : index
    %107 = vector.load %arg14[%c0_64, %c0_65] : memref<1x1xf32, #tpu.memory_space<vmem>>, vector<1x1xf32>
    tpu.vector_store %arg14[%c0_64, %c0_65], %106 {strides = array<i32>} : memref<1x1xf32, #tpu.memory_space<vmem>>, vector<1x1xf32>,
    %c0_66 = arith.constant 0 : index
    %c0_67 = arith.constant 0 : index
    %108 = vector.load %arg7[%c0_66, %c0_67] : memref<8x128xf32, #tpu.memory_space<vmem>>, vector<8x128xf32>
    %c0_68 = arith.constant 0 : index
    %c0_69 = arith.constant 0 : index
    %109 = vector.load %arg21[%c0_68, %c0_69] : memref<1x1xf32, #tpu.memory_space<vmem>>, vector<1x1xf32>
    %110 = arith.mulf %108, %3 : vector<8x128xf32>
    %111 = vector.shape_cast %110 : vector<8x128xf32> to vector<1x8x128xf32>
    %cst_70 = arith.constant dense<0.000000e+00> : vector<1xf32>
    %112 = vector.multi_reduction <add>, %111, %cst_70 [1, 2] : vector<1x8x128xf32> to vector<1xf32>
    %113 = vector.shape_cast %112 : vector<1xf32> to vector<1x1x1xf32>
    %114 = vector.extract %113[0, 0, 0] : f32 from vector<1x1x1xf32>
    %115 = vector.broadcast %114 : f32 to vector<1x1xf32>
    %116 = arith.addf %109, %115 : vector<1x1xf32>
    %c0_71 = arith.constant 0 : index
    %c0_72 = arith.constant 0 : index
    %117 = vector.load %arg21[%c0_71, %c0_72] : memref<1x1xf32, #tpu.memory_space<vmem>>, vector<1x1xf32>
    tpu.vector_store %arg21[%c0_71, %c0_72], %116 {strides = array<i32>} : memref<1x1xf32, #tpu.memory_space<vmem>>, vector<1x1xf32>,
    %c0_73 = arith.constant 0 : index
    %c0_74 = arith.constant 0 : index
    %118 = vector.load %arg15[%c0_73, %c0_74] : memref<1x1xf32, #tpu.memory_space<vmem>>, vector<1x1xf32>
    %119 = arith.mulf %108, %108 : vector<8x128xf32>
    %120 = vector.shape_cast %119 : vector<8x128xf32> to vector<1x8x128xf32>
    %cst_75 = arith.constant dense<0.000000e+00> : vector<1xf32>
    %121 = vector.multi_reduction <add>, %120, %cst_75 [1, 2] : vector<1x8x128xf32> to vector<1xf32>
    %122 = vector.shape_cast %121 : vector<1xf32> to vector<1x1x1xf32>
    %123 = vector.extract %122[0, 0, 0] : f32 from vector<1x1x1xf32>
    %124 = vector.broadcast %123 : f32 to vector<1x1xf32>
    %125 = arith.addf %118, %124 : vector<1x1xf32>
    %c0_76 = arith.constant 0 : index
    %c0_77 = arith.constant 0 : index
    %126 = vector.load %arg15[%c0_76, %c0_77] : memref<1x1xf32, #tpu.memory_space<vmem>>, vector<1x1xf32>
    tpu.vector_store %arg15[%c0_76, %c0_77], %125 {strides = array<i32>} : memref<1x1xf32, #tpu.memory_space<vmem>>, vector<1x1xf32>,
    %c1_i32 = arith.constant 1 : i32
    %127 = arith.cmpi eq, %arg0, %c1_i32 : i32
    %128 = arith.extui %127 : i1 to i32
    %c0_i32_78 = arith.constant 0 : i32
    %129 = arith.cmpi ne, %128, %c0_i32_78 : i32
    scf.if %129 {
      %c0_79 = arith.constant 0 : index
      %c0_80 = arith.constant 0 : index
      %130 = vector.load %arg9[%c0_79, %c0_80] : memref<1x1xf32, #tpu.memory_space<vmem>>, vector<1x1xf32>
      %131 = math.rsqrt %130 : vector<1x1xf32>
      %cst_81 = arith.constant 0.000000e+00 : f32
      %132 = vector.broadcast %cst_81 : f32 to vector<1x1xf32>
      %c0_82 = arith.constant 0 : index
      %c0_83 = arith.constant 0 : index
      %133 = vector.load %arg16[%c0_82, %c0_83] : memref<1x1xf32, #tpu.memory_space<vmem>>, vector<1x1xf32>
      %c0_84 = arith.constant 0 : index
      %c0_85 = arith.constant 0 : index
      %134 = vector.load %arg10[%c0_84, %c0_85] : memref<1x1xf32, #tpu.memory_space<vmem>>, vector<1x1xf32>
      %135 = math.rsqrt %134 : vector<1x1xf32>
      %136 = arith.mulf %133, %135 : vector<1x1xf32>
      %137 = arith.mulf %136, %131 : vector<1x1xf32>
      %cst_86 = arith.constant 1.000000e+00 : f32
      %138 = vector.broadcast %cst_86 : f32 to vector<1x1xf32>
      %139 = arith.mulf %137, %138 : vector<1x1xf32>
      %140 = math.exp %139 : vector<1x1xf32>
      %141 = arith.addf %132, %140 : vector<1x1xf32>
      %c0_87 = arith.constant 0 : index
      %c0_88 = arith.constant 0 : index
      %142 = vector.load %arg17[%c0_87, %c0_88] : memref<1x1xf32, #tpu.memory_space<vmem>>, vector<1x1xf32>
      %c0_89 = arith.constant 0 : index
      %c0_90 = arith.constant 0 : index
      %143 = vector.load %arg11[%c0_89, %c0_90] : memref<1x1xf32, #tpu.memory_space<vmem>>, vector<1x1xf32>
      %144 = math.rsqrt %143 : vector<1x1xf32>
      %145 = arith.mulf %142, %144 : vector<1x1xf32>
      %146 = arith.mulf %145, %131 : vector<1x1xf32>
      %cst_91 = arith.constant 1.000000e+00 : f32
      %147 = vector.broadcast %cst_91 : f32 to vector<1x1xf32>
      %148 = arith.mulf %146, %147 : vector<1x1xf32>
      %149 = math.exp %148 : vector<1x1xf32>
      %150 = arith.addf %141, %149 : vector<1x1xf32>
      %cst_92 = arith.constant 0.000000e+00 : f32
      %151 = vector.broadcast %cst_92 : f32 to vector<1x1xf32>
      %c0_93 = arith.constant 0 : index
      %c0_94 = arith.constant 0 : index
      %152 = vector.load %arg18[%c0_93, %c0_94] : memref<1x1xf32, #tpu.memory_space<vmem>>, vector<1x1xf32>
      %c0_95 = arith.constant 0 : index
      %c0_96 = arith.constant 0 : index
      %153 = vector.load %arg12[%c0_95, %c0_96] : memref<1x1xf32, #tpu.memory_space<vmem>>, vector<1x1xf32>
      %154 = math.rsqrt %153 : vector<1x1xf32>
      %155 = arith.mulf %152, %154 : vector<1x1xf32>
      %156 = arith.mulf %155, %131 : vector<1x1xf32>
      %cst_97 = arith.constant 1.000000e+00 : f32
      %157 = vector.broadcast %cst_97 : f32 to vector<1x1xf32>
      %158 = arith.mulf %156, %157 : vector<1x1xf32>
      %159 = math.exp %158 : vector<1x1xf32>
      %160 = arith.addf %151, %159 : vector<1x1xf32>
      %c0_98 = arith.constant 0 : index
      %c0_99 = arith.constant 0 : index
      %161 = vector.load %arg19[%c0_98, %c0_99] : memref<1x1xf32, #tpu.memory_space<vmem>>, vector<1x1xf32>
      %c0_100 = arith.constant 0 : index
      %c0_101 = arith.constant 0 : index
      %162 = vector.load %arg13[%c0_100, %c0_101] : memref<1x1xf32, #tpu.memory_space<vmem>>, vector<1x1xf32>
      %163 = math.rsqrt %162 : vector<1x1xf32>
      %164 = arith.mulf %161, %163 : vector<1x1xf32>
      %165 = arith.mulf %164, %131 : vector<1x1xf32>
      %cst_102 = arith.constant 1.000000e+00 : f32
      %166 = vector.broadcast %cst_102 : f32 to vector<1x1xf32>
      %167 = arith.mulf %165, %166 : vector<1x1xf32>
      %168 = math.exp %167 : vector<1x1xf32>
      %169 = arith.addf %160, %168 : vector<1x1xf32>
      %c0_103 = arith.constant 0 : index
      %c0_104 = arith.constant 0 : index
      %170 = vector.load %arg20[%c0_103, %c0_104] : memref<1x1xf32, #tpu.memory_space<vmem>>, vector<1x1xf32>
      %c0_105 = arith.constant 0 : index
      %c0_106 = arith.constant 0 : index
      %171 = vector.load %arg14[%c0_105, %c0_106] : memref<1x1xf32, #tpu.memory_space<vmem>>, vector<1x1xf32>
      %172 = math.rsqrt %171 : vector<1x1xf32>
      %173 = arith.mulf %170, %172 : vector<1x1xf32>
      %174 = arith.mulf %173, %131 : vector<1x1xf32>
      %cst_107 = arith.constant 1.000000e+00 : f32
      %175 = vector.broadcast %cst_107 : f32 to vector<1x1xf32>
      %176 = arith.mulf %174, %175 : vector<1x1xf32>
      %177 = math.exp %176 : vector<1x1xf32>
      %178 = arith.addf %169, %177 : vector<1x1xf32>
      %c0_108 = arith.constant 0 : index
      %c0_109 = arith.constant 0 : index
      %179 = vector.load %arg21[%c0_108, %c0_109] : memref<1x1xf32, #tpu.memory_space<vmem>>, vector<1x1xf32>
      %c0_110 = arith.constant 0 : index
      %c0_111 = arith.constant 0 : index
      %180 = vector.load %arg15[%c0_110, %c0_111] : memref<1x1xf32, #tpu.memory_space<vmem>>, vector<1x1xf32>
      %181 = math.rsqrt %180 : vector<1x1xf32>
      %182 = arith.mulf %179, %181 : vector<1x1xf32>
      %183 = arith.mulf %182, %131 : vector<1x1xf32>
      %cst_112 = arith.constant 1.000000e+00 : f32
      %184 = vector.broadcast %cst_112 : f32 to vector<1x1xf32>
      %185 = arith.mulf %183, %184 : vector<1x1xf32>
      %186 = math.exp %185 : vector<1x1xf32>
      %187 = arith.addf %178, %186 : vector<1x1xf32>
      %188 = arith.addf %150, %187 : vector<1x1xf32>
      %189 = arith.divf %150, %188 : vector<1x1xf32>
      %190 = math.log %189 : vector<1x1xf32>
      %cst_113 = arith.constant 0.000000e+00 : f32
      %191 = vector.broadcast %cst_113 : f32 to vector<1x1xf32>
      %192 = arith.subf %191, %190 : vector<1x1xf32>
      %c0_114 = arith.constant 0 : index
      %c0_115 = arith.constant 0 : index
      %193 = vector.load %arg8[%c0_114, %c0_115] : memref<1x1xf32, #tpu.memory_space<vmem>>, vector<1x1xf32>
      tpu.vector_store %arg8[%c0_114, %c0_115], %192 {strides = array<i32>} : memref<1x1xf32, #tpu.memory_space<vmem>>, vector<1x1xf32>,
    } else {
    }
    return
  }
  func.func @transform_0(%arg0: i32) -> (i32, i32) {
    %c0_i32 = arith.constant 0 : i32
    %c0_i32_0 = arith.constant 0 : i32
    return %arg0, %c0_i32 : i32, i32
  }
  func.func @transform_1(%arg0: i32) -> (i32, i32) {
    %c0_i32 = arith.constant 0 : i32
    %c0_i32_0 = arith.constant 0 : i32
    return %arg0, %c0_i32 : i32, i32
  }
  func.func @transform_2(%arg0: i32) -> (i32, i32) {
    %c0_i32 = arith.constant 0 : i32
    %c0_i32_0 = arith.constant 0 : i32
    return %arg0, %c0_i32 : i32, i32
  }
  func.func @transform_3(%arg0: i32) -> (i32, i32) {
    %c0_i32 = arith.constant 0 : i32
    %c0_i32_0 = arith.constant 0 : i32
    return %arg0, %c0_i32 : i32, i32
  }
  func.func @transform_4(%arg0: i32) -> (i32, i32) {
    %c0_i32 = arith.constant 0 : i32
    %c0_i32_0 = arith.constant 0 : i32
    return %arg0, %c0_i32 : i32, i32
  }
  func.func @transform_5(%arg0: i32) -> (i32, i32) {
    %c0_i32 = arith.constant 0 : i32
    %c0_i32_0 = arith.constant 0 : i32
    return %arg0, %c0_i32 : i32, i32
  }
  func.func @transform_6(%arg0: i32) -> (i32, i32) {
    %c0_i32 = arith.constant 0 : i32
    %c0_i32_0 = arith.constant 0 : i32
    return %arg0, %c0_i32 : i32, i32
  }
  func.func @transform_7(%arg0: i32) -> (i32, i32) {
    %c0_i32 = arith.constant 0 : i32
    %c0_i32_0 = arith.constant 0 : i32
    %c0_i32_1 = arith.constant 0 : i32
    return %c0_i32, %c0_i32_0 : i32, i32
  }
}

</mosaic_0001>

<bundles_post_ra>
// kernel: tpu_custom_call.1
= control target key start
LH: loop header
LB: loop body
LE: loop exit
PB: predicated region body
PF: predicated region fallthrough
CT: control target
= control target key end

     0   :  { %s1919_s0 = inlined_call_operand.hbm [shape: f32[16,128], index: 0, kind: input, shape index: {}]   ;;  %s1920_s1 = inlined_call_operand.hbm [shape: f32[16,128], index: 1, kind: input, shape index: {}]   ;;  %s1921_s2 = inlined_call_operand.hbm [shape: f32[16,128], index: 2, kind: input, shape index: {}]   ;;  %s1922_s3 = inlined_call_operand.hbm [shape: f32[16,128], index: 3, kind: input, shape index: {}]   ;;  %s1923_s4 = inlined_call_operand.hbm [shape: f32[16,128], index: 4, kind: input, shape index: {}]   ;;  %s1924_s5 = inlined_call_operand.hbm [shape: f32[16,128], index: 5, kind: input, shape index: {}]   ;;  %s1925_s6 = inlined_call_operand.hbm [shape: f32[16,128], index: 6, kind: input, shape index: {}]   ;;  %s1926_s7 = inlined_call_operand.hbm [shape: f32[1,1], index: 7, kind: output, shape index: {}]  }
   0x1   :  { %1931 = sst [smem:[#allocation34_spill]] %s1920_s1 }
   0x2   :  { %1932 = sst [smem:[#allocation35_spill]] %s1922_s3 }
   0x3   :  { %12 = vsyncpa [#allocation16], 0 }
   0x4   :  { %14 = vsyncpa [#allocation16 + $0x1], 0 }
   0x5   :  { %15 = vsyncpa [#allocation19], 0 }
   0x6   :  { %17 = vsyncpa [#allocation19 + $0x1], 0 }
   0x7   :  { %18 = vsyncpa [#allocation22], 0 }
   0x8   :  { %20 = vsyncpa [#allocation22 + $0x1], 0 }
   0x9   :  { %21 = vsyncpa [#allocation25], 0 }
   0xa   :  { %23 = vsyncpa [#allocation25 + $0x1], 0 }
   0xb   :  { %24 = vsyncpa [#allocation17], 0  ;;  %s1538_s24 = smov 0   ;;  %s1540_s25 = smov 0  }
   0xc   :  { %s1542_s26 = smov 0   ;;  %s1544_s27 = smov 0  }
   0xd LB: > { %s1557_s28 = sadd.s32 4294967295, %s1494_s27   ;;  %s1560_s29 = sadd.s32 1, %s1494_s27   ;;  %s1494_s27 = sphi %s1544_s27, %s1960_s27   ;;  %s1490_s26 = sphi %s1542_s26, %s1959_s26   ;;  %s1486_s25 = sphi %s1540_s25, %s1958_s25   ;;  %s1482_s24 = sphi %s1538_s24, %s1957_s24  }
   0xe   : > { %s34_s30 = ssub.s32 %s1494_s27, %s1560_s29  ;;  %s37_s8 = sadd.s32 1, %s1490_s26 }
   0xf   : > { %p35_p0 = scmp.eq.s32.totalorder %s34_s30, 0  ;;  %p44_p1 = scmp.ne.s32.totalorder %s1490_s26, %s1486_s25 }
  0x10   : > { %p45_p2 = scmp.eq.s32.totalorder %s1494_s27, 0  ;;  %p50_p3 = scmp.ne.s32.totalorder %s1486_s25, %s1482_s24 }
  0x11   : > { %s1570_s9 = scalar_select %p35_p0, %s1490_s26, %s37_s8  }
  0x12   : > { %p46_p4 = por %p45_p2, %p44_p1  ;;  %p51_p5 = scmp.eq.s32.totalorder %s1557_s28, 0 }
  0x13   : > { %1933 = sst [smem:[#allocation33_spill]] %s1570_s9  ;;  %p1139_p6 = scmp.lt.s32.totalorder %s1494_s27, 2 }
  0x14   : > { %p1574_p7 = por %p51_p5, %p50_p3  ;;  %s1927_s11 = sand.u32 1, %s1490_s26  }
  0x15   : > { %s1581_s12 = sshll.u32 %s1927_s11, 3  ;;  %s1584_s13 = sshll.u32 %s1494_s27, 3 }
  0x16   : > { %p1586_p8 = pnand %p1139_p6, %p46_p4  ;;  %s1591_s15 = sand.u32 1, %s1494_s27  }
  0x17   : > { %s1936_s1 = sld [smem:[#allocation34_spill]]  ;;  %s274_s20 = scalar_lea.vmem [#allocation18], %s1581_s12 }
  0x18   : > { %s282_s21 = sshll.u32 %s274_s20, 4  ;;  %s1928_s22 = scalar_lea.sflag [#allocation19], %s1591_s15  ;;  %s283_s21 = int_to_ptr.vmem [resolvable:$true] %s282_s21 }
  0x19   : > { %p1601_p10 = pneg %p1586_p8 }
  0x1d   : > { %s278_s18 = scalar_lea.hbm %s1936_s1, %s1584_s13  ;;  %s1213_s17 = scalar_lea.hbm %s1936_s1, 16 }
  0x1e   : > { %s280_s19 = sshll.u32 %s278_s18, 4  ;;  %s281_s19 = int_to_ptr.hbm [resolvable:$true] %s280_s19 }
  0x1f   : > { %s1206_s23 = sshra.s32 %s281_s19, 4  ;;  %s1207_s23 = int_to_ptr.hbm [resolvable:$true] %s1206_s23 }
  0x20   : > { %s1208_s24 = scalar_lea.hbm %s1207_s23, 8  ;;  %p1214_p13 = scmp.lt.s32.totalorder %s1207_s23, %s1936_s1 }
  0x21   : > { %p1209_p9 = scmp.ne.s32.totalorder %s1207_s23, %s1208_s24  ;;  %p1215_p0 = scmp.lt.s32.totalorder %s1213_s17, %s1208_s24 }
  0x23   : > { %p1211_p11 = pnand %p1601_p10, %p1209_p9  ;;  %p1216_p1 = por %p1215_p0, %p1214_p13 }
  0x25   : > { %p1212_p12 = pneg %p1211_p11 }
  0x27   : > { %p1217_p2 = pnand %p1216_p1, %p1212_p12 }
  0x29   : > { %1220 = shalt.err (!%p1217_p2)
}
  0x2a   : > { %1123 = dma.hbm_to_vmem [thread:$0]  (!%p1586_p8), %s281_s19, 128, %s283_s21, %s1928_s22  }
  0x2b   : > { %p1059_p3 = scmp.ge.s32.totalorder %s1494_s27, 1  ;;  %p382_p4 = scmp.lt.s32.totalorder %s1494_s27, 3 }
  0x2c   : > { %s1939_s3 = sld [smem:[#allocation35_spill]]  ;;  %s312_s18 = scalar_lea.vmem [#allocation21], %s1581_s12 }
  0x2d   : > { %p1619_p5 = pnand %p1059_p3, %p382_p4  ;;  %s320_s20 = sshll.u32 %s312_s18, 4  ;;  %s321_s20 = int_to_ptr.vmem [resolvable:$true] %s320_s20 }
  0x2e   : > { %s1929_s11 = scalar_lea.sflag [#allocation22], %s1591_s15 }
  0x32   : > { %s316_s16 = scalar_lea.hbm %s1939_s3, %s1584_s13  ;;  %s1243_s21 = scalar_lea.hbm %s1939_s3, 16 }
  0x33   : > { %s318_s17 = sshll.u32 %s316_s16, 4  ;;  %s319_s17 = int_to_ptr.hbm [resolvable:$true] %s318_s17 }
  0x34   : > { %s1236_s1 = sshra.s32 %s319_s17, 4  ;;  %s1237_s1 = int_to_ptr.hbm [resolvable:$true] %s1236_s1 }
  0x35   : > { %s1238_s9 = scalar_lea.hbm %s1237_s1, 8  ;;  %p1244_p12 = scmp.lt.s32.totalorder %s1237_s1, %s1939_s3 }
  0x36   : > { %p1239_p6 = scmp.ne.s32.totalorder %s1237_s1, %s1238_s9  ;;  %p1245_p13 = scmp.lt.s32.totalorder %s1243_s21, %s1238_s9 }
  0x38   : > { %p1241_p9 = pnand %p1239_p6, %p1601_p10  ;;  %p1246_p0 = por %p1245_p13, %p1244_p12 }
  0x3a   : > { %p1242_p11 = pneg %p1241_p9 }
  0x3c   : > { %p1247_p1 = pnand %p1246_p0, %p1242_p11 }
  0x3e   : > { %1250 = shalt.err (!%p1247_p1)
}
  0x3f   : > { %1129 = dma.hbm_to_vmem [thread:$0]  (!%p1586_p8), %s319_s17, 128, %s321_s20, %s1929_s11  }
  0x40   : > { %s354_s18 = scalar_lea.hbm %s1924_s5, %s1584_s13  ;;  %s350_s27 = scalar_lea.vmem [#allocation24], %s1581_s12 }
  0x41   : > { %s358_s22 = sshll.u32 %s350_s27, 4  ;;  %s356_s1 = sshll.u32 %s354_s18, 4  ;;  %s359_s22 = int_to_ptr.vmem [resolvable:$true] %s358_s22  ;;  %s357_s1 = int_to_ptr.hbm [resolvable:$true] %s356_s1 }
  0x42   : > { %s1930_s9 = scalar_lea.sflag [#allocation25], %s1591_s15  ;;  %s1266_s19 = sshra.s32 %s357_s1, 4  ;;  %s1267_s19 = int_to_ptr.hbm [resolvable:$true] %s1266_s19 }
  0x43   : > { %s1268_s21 = scalar_lea.hbm %s1267_s19, 8  ;;  %s1273_s17 = scalar_lea.hbm %s1924_s5, 16 }
  0x44   : > { %p1269_p2 = scmp.ne.s32.totalorder %s1267_s19, %s1268_s21  ;;  %p1274_p6 = scmp.lt.s32.totalorder %s1267_s19, %s1924_s5 }
  0x45   : > { %p1275_p9 = scmp.lt.s32.totalorder %s1273_s17, %s1268_s21 }
  0x46   : > { %p1271_p3 = pnand %p1269_p2, %p1601_p10 }
  0x47   : > { %p1276_p11 = por %p1275_p9, %p1274_p6 }
  0x48   : > { %p1272_p4 = pneg %p1271_p3 }
  0x4a   : > { %p1277_p12 = pnand %p1276_p11, %p1272_p4 }
  0x4c   : > { %1280 = shalt.err (!%p1277_p12)
}
  0x4d   : > { %1135 = dma.hbm_to_vmem [thread:$0]  (!%p1586_p8), %s357_s1, 128, %s359_s22, %s1930_s9  }
  0x4e   : > { %s259_s18 = scalar_lea.hbm %s1919_s0, %s1584_s13  ;;  %s255_s23 = scalar_lea.vmem [#allocation15], %s1581_s12 }
  0x4f   : > { %s261_s27 = sshll.u32 %s259_s18, 4  ;;  %s263_s19 = sshll.u32 %s255_s23, 4  ;;  %s262_s27 = int_to_ptr.hbm [resolvable:$true] %s261_s27  ;;  %s264_s19 = int_to_ptr.vmem [resolvable:$true] %s263_s19 }
  0x50   : > { %s1940_s21 = sand.u32 1, %s1490_s26   ;;  %s1296_s20 = sshra.s32 %s262_s27, 4  ;;  %s1297_s20 = int_to_ptr.hbm [resolvable:$true] %s1296_s20 }
  0x51   : > { %s252_s17 = scalar_lea.sflag [#allocation16], %s1940_s21  ;;  %s1298_s24 = scalar_lea.hbm %s1297_s20, 8 }
  0x52   : > { %p1299_p13 = scmp.ne.s32.totalorder %s1297_s20, %s1298_s24  ;;  %s1303_s1 = scalar_lea.hbm %s1919_s0, 16 }
  0x53   : > { %p1304_p2 = scmp.lt.s32.totalorder %s1297_s20, %s1919_s0  ;;  %p1305_p3 = scmp.lt.s32.totalorder %s1303_s1, %s1298_s24 }
  0x54   : > { %p1301_p0 = pnand %p1299_p13, %p1601_p10 }
  0x55   : > { %p1306_p4 = por %p1305_p3, %p1304_p2 }
  0x56   : > { %p1302_p1 = pneg %p1301_p0 }
  0x58   : > { %p1307_p6 = pnand %p1306_p4, %p1302_p1 }
  0x5a   : > { %1310 = shalt.err (!%p1307_p6)
}
  0x5b   : > { %1120 = dma.hbm_to_vmem [thread:$0]  (!%p1586_p8), %s262_s27, 128, %s264_s19, %s252_s17  }
  0x5c   : > { %s297_s21 = scalar_lea.hbm %s1921_s2, %s1584_s13  ;;  %s293_s22 = scalar_lea.vmem [#allocation20], %s1581_s12 }
  0x5d   : > { %s299_s11 = sshll.u32 %s297_s21, 4  ;;  %s301_s9 = sshll.u32 %s293_s22, 4  ;;  %s300_s11 = int_to_ptr.hbm [resolvable:$true] %s299_s11  ;;  %s302_s9 = int_to_ptr.vmem [resolvable:$true] %s301_s9 }
  0x5e   : > { %s1326_s20 = sshra.s32 %s300_s11, 4  ;;  %s1333_s27 = scalar_lea.hbm %s1921_s2, 16  ;;  %s1327_s20 = int_to_ptr.hbm [resolvable:$true] %s1326_s20 }
  0x5f   : > { %s1328_s24 = scalar_lea.hbm %s1327_s20, 8  ;;  %p1334_p13 = scmp.lt.s32.totalorder %s1327_s20, %s1921_s2 }
  0x60   : > { %p1329_p9 = scmp.ne.s32.totalorder %s1327_s20, %s1328_s24  ;;  %p1335_p0 = scmp.lt.s32.totalorder %s1333_s27, %s1328_s24 }
  0x62   : > { %p1331_p11 = pnand %p1329_p9, %p1601_p10  ;;  %p1336_p1 = por %p1335_p0, %p1334_p13 }
  0x64   : > { %p1332_p12 = pneg %p1331_p11 }
  0x66   : > { %p1337_p2 = pnand %p1336_p1, %p1332_p12 }
  0x68   : > { %1340 = shalt.err (!%p1337_p2)
}
  0x69   : > { %s1941_s3 = scalar_lea.sflag [#allocation19], %s1591_s15  ;;  %s335_s21 = scalar_lea.hbm %s1923_s4, %s1584_s13 }
  0x6a   : > { %1126 = dma.hbm_to_vmem [thread:$0]  (!%p1586_p8), %s300_s11, 128, %s302_s9, %s1941_s3  }
  0x6b   : > { %s337_s22 = sshll.u32 %s335_s21, 4  ;;  %s331_s1 = scalar_lea.vmem [#allocation23], %s1581_s12  ;;  %s338_s22 = int_to_ptr.hbm [resolvable:$true] %s337_s22 }
  0x6c   : > { %s339_s16 = sshll.u32 %s331_s1, 4  ;;  %s1356_s20 = sshra.s32 %s338_s22, 4  ;;  %s340_s16 = int_to_ptr.vmem [resolvable:$true] %s339_s16  ;;  %s1357_s20 = int_to_ptr.hbm [resolvable:$true] %s1356_s20 }
  0x6d   : > { %s1358_s24 = scalar_lea.hbm %s1357_s20, 8  ;;  %s1363_s9 = scalar_lea.hbm %s1923_s4, 16 }
  0x6e   : > { %p1359_p3 = scmp.ne.s32.totalorder %s1357_s20, %s1358_s24  ;;  %p1364_p9 = scmp.lt.s32.totalorder %s1357_s20, %s1923_s4 }
  0x6f   : > { %p1365_p11 = scmp.lt.s32.totalorder %s1363_s9, %s1358_s24 }
  0x70   : > { %p1361_p4 = pnand %p1359_p3, %p1601_p10 }
  0x71   : > { %p1366_p12 = por %p1365_p11, %p1364_p9 }
  0x72   : > { %p1362_p6 = pneg %p1361_p4 }
  0x74   : > { %p1367_p13 = pnand %p1366_p12, %p1362_p6 }
  0x76   : > { %1370 = shalt.err (!%p1367_p13)
}
  0x77   : > { %s1942_s3 = scalar_lea.sflag [#allocation22], %s1591_s15  ;;  %s373_s21 = scalar_lea.hbm %s1925_s6, %s1584_s13 }
  0x78   : > { %1132 = dma.hbm_to_vmem [thread:$0]  (!%p1586_p8), %s338_s22, 128, %s340_s16, %s1942_s3  }
  0x79   : > { %s375_s1 = sshll.u32 %s373_s21, 4  ;;  %s369_s27 = scalar_lea.vmem [#allocation26], %s1581_s12  ;;  %s376_s1 = int_to_ptr.hbm [resolvable:$true] %s375_s1 }
  0x7a   : > { %s377_s19 = sshll.u32 %s369_s27, 4  ;;  %s1386_s20 = sshra.s32 %s376_s1, 4  ;;  %s378_s19 = int_to_ptr.vmem [resolvable:$true] %s377_s19  ;;  %s1387_s20 = int_to_ptr.hbm [resolvable:$true] %s1386_s20 }
  0x7b   : > { %s1388_s24 = scalar_lea.hbm %s1387_s20, 8  ;;  %s1393_s22 = scalar_lea.hbm %s1925_s6, 16 }
  0x7c   : > { %p1389_p0 = scmp.ne.s32.totalorder %s1387_s20, %s1388_s24  ;;  %p1394_p3 = scmp.lt.s32.totalorder %s1387_s20, %s1925_s6 }
  0x7d   : > { %p1395_p4 = scmp.lt.s32.totalorder %s1393_s22, %s1388_s24 }
  0x7e   : > { %p1391_p1 = pnand %p1389_p0, %p1601_p10 }
  0x7f   : > { %p1396_p6 = por %p1395_p4, %p1394_p3 }
  0x80   : > { %p1392_p2 = pneg %p1391_p1 }
  0x82   : > { %p1397_p9 = pnand %p1396_p6, %p1392_p2 }
  0x84   : > { %1400 = shalt.err (!%p1397_p9)
}
  0x85   : > { %s1943_s12 = scalar_lea.sflag [#allocation25], %s1591_s15  ;;  %386 = sbr.rel (%p1619_p5) target bundleno = 466 (0x1d2), region = 48 }
  0x86   : > { %1138 = dma.hbm_to_vmem [thread:$0]  (!%p1586_p8), %s376_s1, 128, %s378_s19, %s1943_s12  }
  0x87   : > { %s388_s13 = sand.u32 (!%p1619_p5), 1, %s1486_s25  }
  0x88   : > { %s1730_s30 = sshll.u32 (!%p1619_p5), %s388_s13, 3  ;;  %s389_s3 = scalar_lea.sflag (!%p1619_p5), [#allocation16], %s388_s13 }
  0x89   : > { %s392_s18 = scalar_lea.vmem (!%p1619_p5), [#allocation15], %s1730_s30 }
  0x8a   : > { %1461 = dma.done.wait (%p1574_p7), %s389_s3, 128  }
  0x8b   : > { %1463 = vsyncadd (%p1574_p7), %s389_s3, 4294967168  ;;  %s398_s14 = sand.u32 1, %s1557_s28   ;;  %s402_s8 = scalar_lea.vmem [#allocation18], %s1730_s30 }
  0x8c   : > { %s399_s15 = scalar_lea.sflag [#allocation19], %s398_s14 }
  0x8d   : > { %1465 = dma.done.wait (%p1574_p7), %s399_s15, 256  }
  0x8e   : > { %1467 = vsyncadd (%p1574_p7), %s399_s15, 4294967040  ;;  %s412_s23 = scalar_lea.vmem [#allocation20], %s1730_s30  ;;  %s419_s21 = scalar_lea.sflag [#allocation22], %s398_s14 }
  0x8f   : > { %s422_s1 = scalar_lea.vmem [#allocation21], %s1730_s30 }
  0x90   : > { %1469 = dma.done.wait (%p1574_p7), %s419_s21, 256  }
  0x91   : > { %1471 = vsyncadd (%p1574_p7), %s419_s21, 4294967040  ;;  %s432_s27 = scalar_lea.vmem [#allocation23], %s1730_s30  ;;  %s439_s19 = scalar_lea.sflag [#allocation25], %s398_s14 }
  0x92   : > { %s442_s20 = scalar_lea.vmem [#allocation24], %s1730_s30 }
  0x93   : > { %1473 = dma.done.wait (%p1574_p7), %s439_s19, 256  }
  0x94   : > { %1475 = vsyncadd (%p1574_p7), %s439_s19, 4294967040  ;;  %s452_s24 = scalar_lea.vmem [#allocation26], %s1730_s30  ;;  %p1067_p8 = scmp.ne.s32.totalorder %s1557_s28, 0 }
  0x96   : > { %512 = sbr.rel (%p1067_p8) target bundleno = 169 (0xa9), region = 80 }
  0x9b   : > { %vm513_vm0 = vcmask 0   ;;  %v1496_v0 = vmov 0.0  }
  0x9c   : > { %514 = vst.msk [vmem:[#allocation2] sm:$0x1] %vm513_vm0, %v1496_v0 }
  0x9d   : > { %515 = vst.msk [vmem:[#allocation3] sm:$0x1] %vm513_vm0, %v1496_v0 }
  0x9e   : > { %516 = vst.msk [vmem:[#allocation4] sm:$0x1] %vm513_vm0, %v1496_v0 }
  0x9f   : > { %517 = vst.msk [vmem:[#allocation5] sm:$0x1] %vm513_vm0, %v1496_v0 }
  0xa0   : > { %518 = vst.msk [vmem:[#allocation6] sm:$0x1] %vm513_vm0, %v1496_v0 }
  0xa1   : > { %519 = vst.msk [vmem:[#allocation7] sm:$0x1] %vm513_vm0, %v1496_v0 }
  0xa2   : > { %520 = vst.msk [vmem:[#allocation8] sm:$0x1] %vm513_vm0, %v1496_v0 }
  0xa3   : > { %521 = vst.msk [vmem:[#allocation9] sm:$0x1] %vm513_vm0, %v1496_v0 }
  0xa4   : > { %522 = vst.msk [vmem:[#allocation10] sm:$0x1] %vm513_vm0, %v1496_v0 }
  0xa5   : > { %523 = vst.msk [vmem:[#allocation11] sm:$0x1] %vm513_vm0, %v1496_v0 }
  0xa6   : > { %524 = vst.msk [vmem:[#allocation12] sm:$0x1] %vm513_vm0, %v1496_v0 }
  0xa7   : > { %525 = vst.msk [vmem:[#allocation13] sm:$0x1] %vm513_vm0, %v1496_v0 }
  0xa8   : > { %526 = vst.msk [vmem:[#allocation14] sm:$0x1] %vm513_vm0, %v1496_v0 }
  0xa9 PF: > { %v543_v1 = vld [vmem:[%s402_s8] sm:$0xff]  ;;  %v527_v2 = vld [vmem:[%s392_s18] sm:$0xff]  ;;  %vm541_vm1 = vcmask 0   ;;  %p1068_p7 = scmp.ne.s32.totalorder %s1557_s28, 1 }
  0xaa   : > { %v572_v3 = vld [vmem:[%s412_s23] sm:$0xff]  ;;  %v559_v4 = vmul.f32 %v543_v1, %v543_v1  ;;  %v529_v5 = vmul.f32 %v527_v2, %v527_v2  ;;  %v601_v7 = vld [vmem:[%s422_s1] sm:$0xff]  ;;  %v545_v9 = vmul.f32 %v543_v1, %v527_v2 }
  0xab   : > { %v588_v6 = vmul.f32 %v572_v3, %v572_v3  ;;  %v574_v8 = vmul.f32 %v572_v3, %v527_v2  ;;  %v603_v10 = vmul.f32 %v601_v7, %v527_v2  ;;  %v630_v11 = vld [vmem:[%s432_s27] sm:$0xff]  ;;  %v617_v12 = vmul.f32 %v601_v7, %v601_v7  ;;  %v659_v15 = vld [vmem:[%s442_s20] sm:$0xff] }
  0xac   : > { %560 = vadd.xlane.f32.xlu1 %v559_v4  ;;  %530 = vadd.xlane.f32.xlu0 %v529_v5  ;;  %v632_v13 = vmul.f32 %v630_v11, %v527_v2  ;;  %v646_v14 = vmul.f32 %v630_v11, %v630_v11  ;;  %v688_v16 = vld [vmem:[%s452_s24] sm:$0xff]  ;;  %v661_v17 = vmul.f32 %v659_v15, %v527_v2 }
  0xad   : > { %589 = vadd.xlane.f32.xlu2 %v588_v6  ;;  %v675_v18 = vmul.f32 %v659_v15, %v659_v15  ;;  %v690_v19 = vmul.f32 %v688_v16, %v527_v2  ;;  %v704_v20 = vmul.f32 %v688_v16, %v688_v16 }
  0xb4   : > { %575 = vadd.xlane.f32.xlu1 %v574_v8  ;;  %546 = vadd.xlane.f32.xlu0 %v545_v9 }
  0xb5   : > { %604 = vadd.xlane.f32.xlu2 %v603_v10 }
  0xbc   : > { %618 = vadd.xlane.f32.xlu0 %v617_v12  ;;  %633 = vadd.xlane.f32.xlu1 %v632_v13 }
  0xbd   : > { %647 = vadd.xlane.f32.xlu2 %v646_v14 }
  0xc4   : > { %662 = vadd.xlane.f32.xlu0 %v661_v17  ;;  %676 = vadd.xlane.f32.xlu1 %v675_v18 }
  0xc5   : > { %691 = vadd.xlane.f32.xlu2 %v690_v19 }
  0xcc   : > { %705 = vadd.xlane.f32.xlu0 %v704_v20 }
 0x11f   : > { %v561_v21 = vpop.xlane.xlu1 %560  ;;  %v531_v22 = vpop.xlane.xlu0 %530 }
 0x120   : > { %v562_v23 = vrot.slane %v561_v21, 4  ;;  %v532_v24 = vrot.slane %v531_v22, 4  ;;  %v590_v25 = vpop.xlane.xlu2 %589 }
 0x121   : > { %v591_v26 = vrot.slane %v590_v25, 4 }
 0x122   : > { %v533_v27 = vadd.f32 %v532_v24, %v531_v22  ;;  %v563_v28 = vadd.f32 %v562_v23, %v561_v21 }
 0x123   : > { %v592_v30 = vadd.f32 %v591_v26, %v590_v25 }
 0x124   : > { %v534_v29 = vrot.slane %v533_v27, 2  ;;  %v564_v32 = vrot.slane %v563_v28, 2 }
 0x125   : > { %v593_v39 = vrot.slane %v592_v30, 2 }
 0x126   : > { %v535_v31 = vadd.f32 %v534_v29, %v533_v27  ;;  %v565_v45 = vadd.f32 %v564_v32, %v563_v28 }
 0x127   : > { %v576_v33 = vpop.xlane.xlu1 %575  ;;  %v547_v34 = vpop.xlane.xlu0 %546  ;;  %v594_v49 = vadd.f32 %v593_v39, %v592_v30 }
 0x128   : > { %v577_v35 = vrot.slane %v576_v33, 4  ;;  %v548_v36 = vrot.slane %v547_v34, 4  ;;  %v605_v37 = vpop.xlane.xlu2 %604  ;;  %v536_v38 = vrot.slane %v535_v31, 1  ;;  %v566_v54 = vrot.slane %v565_v45, 1 }
 0x129   : > { %v606_v40 = vrot.slane %v605_v37, 4  ;;  %v595_v62 = vrot.slane %v594_v49, 1 }
 0x12a   : > { %v578_v41 = vadd.f32 %v577_v35, %v576_v33  ;;  %v549_v42 = vadd.f32 %v548_v36, %v547_v34  ;;  %v537_v43 = vadd.f32 %v536_v38, %v535_v31  ;;  %v567_v5 = vadd.f32 %v566_v54, %v565_v45  ;;  %v573_v54 = vld [vmem:[#allocation10] sm:$0x1] }
 0x12b   : > { %v607_v44 = vadd.f32 %v606_v40, %v605_v37  ;;  %v596_v10 = vadd.f32 %v595_v62, %v594_v49 }
 0x12c   : > { %v579_v46 = vrot.slane %v578_v41, 2  ;;  %v550_v47 = vrot.slane %v549_v42, 2  ;;  %1073 = vpush %v537_v43 }
 0x12d   : > { %v608_v48 = vrot.slane %v607_v44, 2 }
 0x12e   : > { %v551_v50 = vadd.f32 %v550_v47, %v549_v42  ;;  %v580_v51 = vadd.f32 %v579_v46, %v578_v41 }
 0x12f   : > { %v619_v52 = vpop.xlane.xlu0 %618  ;;  %v634_v53 = vpop.xlane.xlu1 %633  ;;  %v609_v55 = vadd.f32 %v608_v48, %v607_v44  ;;  %v528_v48 = vld [vmem:[#allocation2] sm:$0x1] }
 0x130   : > { %v620_v56 = vrot.slane %v619_v52, 4  ;;  %v648_v57 = vpop.xlane.xlu2 %647  ;;  %v635_v58 = vrot.slane %v634_v53, 4  ;;  %v552_v59 = vrot.slane %v551_v50, 1  ;;  %v581_v60 = vrot.slane %v580_v51, 1 }
 0x131   : > { %v649_v61 = vrot.slane %v648_v57, 4  ;;  %v610_v63 = vrot.slane %v609_v55, 1 }
 0x132   : > { %v621_v0 = vadd.f32 %v620_v56, %v619_v52  ;;  %v636_v1 = vadd.f32 %v635_v58, %v634_v53  ;;  %v553_v2 = vadd.f32 %v552_v59, %v551_v50  ;;  %v582_v3 = vadd.f32 %v581_v60, %v580_v51  ;;  %v544_v51 = vld [vmem:[#allocation9] sm:$0x1]  ;;  %v558_v52 = vld [vmem:[#allocation3] sm:$0x1]  ;;  %v602_v60 = vld [vmem:[#allocation11] sm:$0x1] }
 0x133   : > { %v650_v4 = vadd.f32 %v649_v61, %v648_v57  ;;  %v611_v8 = vadd.f32 %v610_v63, %v609_v55  ;;  %v587_v57 = vld [vmem:[#allocation4] sm:$0x1] }
 0x134   : > { %v622_v6 = vrot.slane %v621_v0, 2  ;;  %v637_v7 = vrot.slane %v636_v1, 2  ;;  %1075 = vpush %v553_v2  ;;  %v616_v2 = vld [vmem:[#allocation5] sm:$0x1] }
 0x135   : > { %v651_v9 = vrot.slane %v650_v4, 2  ;;  %1077 = vpush %v567_v5  ;;  %v645_v5 = vld [vmem:[#allocation6] sm:$0x1] }
 0x136   : > { %1079 = vpush %v582_v3  ;;  %v623_v11 = vadd.f32 %v622_v6, %v621_v0  ;;  %v638_v12 = vadd.f32 %v637_v7, %v636_v1  ;;  %v631_v3 = vld [vmem:[#allocation12] sm:$0x1] }
 0x137   : > { %1081 = vpush %v596_v10  ;;  %v663_v13 = vpop.xlane.xlu0 %662  ;;  %v677_v14 = vpop.xlane.xlu1 %676  ;;  %v652_v15 = vadd.f32 %v651_v9, %v650_v4 }
 0x138   : > { %1083 = vpush %v611_v8  ;;  %v664_v16 = vrot.slane %v663_v13, 4  ;;  %v692_v17 = vpop.xlane.xlu2 %691  ;;  %v678_v18 = vrot.slane %v677_v14, 4  ;;  %v624_v19 = vrot.slane %v623_v11, 1  ;;  %v639_v20 = vrot.slane %v638_v12, 1 }
 0x139   : > { %v693_v21 = vrot.slane %v692_v17, 4  ;;  %v653_v22 = vrot.slane %v652_v15, 1 }
 0x13a   : > { %v665_v23 = vadd.f32 %v664_v16, %v663_v13  ;;  %v679_v24 = vadd.f32 %v678_v18, %v677_v14  ;;  %v625_v25 = vadd.f32 %v624_v19, %v623_v11  ;;  %v640_v26 = vadd.f32 %v639_v20, %v638_v12  ;;  %v660_v11 = vld [vmem:[#allocation13] sm:$0x1]  ;;  %v674_v12 = vld [vmem:[#allocation7] sm:$0x1]  ;;  %v689_v14 = vld [vmem:[#allocation14] sm:$0x1] }
 0x13b   : > { %v694_v27 = vadd.f32 %v693_v21, %v692_v17  ;;  %v654_v28 = vadd.f32 %v653_v22, %v652_v15  ;;  %v703_v20 = vld [vmem:[#allocation8] sm:$0x1] }
 0x13c   : > { %v666_v29 = vrot.slane %v665_v23, 2  ;;  %v680_v30 = vrot.slane %v679_v24, 2  ;;  %1085 = vpush %v625_v25 }
 0x13d   : > { %v695_v31 = vrot.slane %v694_v27, 2  ;;  %1087 = vpush %v640_v26 }
 0x13e   : > { %v681_v32 = vadd.f32 %v680_v30, %v679_v24  ;;  %1089 = vpush %v654_v28  ;;  %v667_v33 = vadd.f32 %v666_v29, %v665_v23 }
 0x13f   : > { %v696_v34 = vadd.f32 %v695_v31, %v694_v27  ;;  %v706_v35 = vpop.xlane.xlu0 %705 }
 0x140   : > { %v707_v36 = vrot.slane %v706_v35, 4  ;;  %v668_v37 = vrot.slane %v667_v33, 1  ;;  %v682_v38 = vrot.slane %v681_v32, 1 }
 0x141   : > { %v697_v39 = vrot.slane %v696_v34, 1 }
 0x142   : > { %v708_v40 = vadd.f32 %v707_v36, %v706_v35  ;;  %v669_v41 = vadd.f32 %v668_v37, %v667_v33  ;;  %v683_v42 = vadd.f32 %v682_v38, %v681_v32 }
 0x143   : > { %v698_v43 = vadd.f32 %v697_v39, %v696_v34 }
 0x144   : > { %v709_v44 = vrot.slane %v708_v40, 2  ;;  %1091 = vpush %v669_v41 }
 0x145   : > { %1093 = vpush %v683_v42 }
 0x146   : > { %v710_v45 = vadd.f32 %v709_v44, %v708_v40  ;;  %1095 = vpush %v698_v43 }
 0x148   : > { %v711_v46 = vrot.slane %v710_v45, 1 }
 0x14a   : > { %v712_v47 = vadd.f32 %v711_v46, %v710_v45 }
 0x14c   : > { %1097 = vpush %v712_v47 }
 0x15d   : > { %s1074_s10 = spop %1073 }
 0x15e   : > { %v539_v49 = vstv %s1074_s10 }
 0x15f   : > { %v540_v50 = vadd.f32 %v539_v49, %v528_v48 }
 0x161   : > { %542 = vst.msk [vmem:[#allocation2] sm:$0x1] %vm541_vm1, %v540_v50 }
 0x165   : > { %s1076_s9 = spop %1075 }
 0x166   : > { %v555_v53 = vstv %s1076_s9  ;;  %s1078_s11 = spop %1077 }
 0x167   : > { %v556_v55 = vadd.f32 %v555_v53, %v544_v51  ;;  %v569_v56 = vstv %s1078_s11  ;;  %s1080_s22 = spop %1079 }
 0x168   : > { %v570_v58 = vadd.f32 %v569_v56, %v558_v52  ;;  %v584_v59 = vstv %s1080_s22  ;;  %s1082_s16 = spop %1081 }
 0x169   : > { %557 = vst.msk [vmem:[#allocation9] sm:$0x1] %vm541_vm1, %v556_v55  ;;  %v585_v61 = vadd.f32 %v584_v59, %v573_v54  ;;  %v598_v62 = vstv %s1082_s16  ;;  %s1084_s17 = spop %1083 }
 0x16a   : > { %571 = vst.msk [vmem:[#allocation3] sm:$0x1] %vm541_vm1, %v570_v58  ;;  %v599_v63 = vadd.f32 %v598_v62, %v587_v57  ;;  %v613_v0 = vstv %s1084_s17 }
 0x16b   : > { %586 = vst.msk [vmem:[#allocation10] sm:$0x1] %vm541_vm1, %v585_v61  ;;  %v614_v1 = vadd.f32 %v613_v0, %v602_v60 }
 0x16c   : > { %600 = vst.msk [vmem:[#allocation4] sm:$0x1] %vm541_vm1, %v599_v63 }
 0x16d   : > { %615 = vst.msk [vmem:[#allocation11] sm:$0x1] %vm541_vm1, %v614_v1  ;;  %s1086_s12 = spop %1085 }
 0x16e   : > { %v627_v4 = vstv %s1086_s12  ;;  %s1088_s13 = spop %1087 }
 0x16f   : > { %v628_v6 = vadd.f32 %v627_v4, %v616_v2  ;;  %v642_v7 = vstv %s1088_s13  ;;  %s1090_s30 = spop %1089 }
 0x170   : > { %v643_v8 = vadd.f32 %v642_v7, %v631_v3  ;;  %v656_v9 = vstv %s1090_s30 }
 0x171   : > { %629 = vst.msk [vmem:[#allocation5] sm:$0x1] %vm541_vm1, %v628_v6  ;;  %v657_v10 = vadd.f32 %v656_v9, %v645_v5 }
 0x172   : > { %644 = vst.msk [vmem:[#allocation12] sm:$0x1] %vm541_vm1, %v643_v8 }
 0x173   : > { %658 = vst.msk [vmem:[#allocation6] sm:$0x1] %vm541_vm1, %v657_v10 }
 0x175   : > { %s1092_s3 = spop %1091 }
 0x176   : > { %v671_v13 = vstv %s1092_s3  ;;  %s1094_s18 = spop %1093 }
 0x177   : > { %v672_v15 = vadd.f32 %v671_v13, %v660_v11  ;;  %v685_v16 = vstv %s1094_s18  ;;  %s1096_s14 = spop %1095 }
 0x178   : > { %v686_v17 = vadd.f32 %v685_v16, %v674_v12  ;;  %v700_v18 = vstv %s1096_s14 }
 0x179   : > { %673 = vst.msk [vmem:[#allocation13] sm:$0x1] %vm541_vm1, %v672_v15  ;;  %v701_v19 = vadd.f32 %v700_v18, %v689_v14 }
 0x17a   : > { %687 = vst.msk [vmem:[#allocation7] sm:$0x1] %vm541_vm1, %v686_v17 }
 0x17b   : > { %702 = vst.msk [vmem:[#allocation14] sm:$0x1] %vm541_vm1, %v701_v19 }
 0x17d   : > { %s1098_s15 = spop %1097  ;;  %720 = sbr.rel (%p1068_p7) target bundleno = 461 (0x1cd), region = 84 }
 0x17e   : > { %v714_v21 = vstv %s1098_s15 }
 0x17f   : > { %v715_v22 = vadd.f32 %v714_v21, %v703_v20 }
 0x181   : > { %716 = vst.msk [vmem:[#allocation8] sm:$0x1] %vm541_vm1, %v715_v22 }
 0x182   : > { %v721_v23 = vld [vmem:[#allocation2] sm:$0x1]  ;;  %v733_v24 = vld [vmem:[#allocation3] sm:$0x1]  ;;  %v750_v25 = vld [vmem:[#allocation4] sm:$0x1] }
 0x183   : > { %1176 = vrsqrt.f32 %v721_v23  ;;  %v767_v26 = vld [vmem:[#allocation5] sm:$0x1]  ;;  %v1785_v27 = vld [vmem:[#allocation6] sm:$0x1]  ;;  %v1787_v28 = vld [vmem:[#allocation7] sm:$0x1]  ;;  %vm728_vm2 = vweird.f32 %v721_v23  ;;  %vm740_vm3 = vweird.f32 %v733_v24  ;;  %vm757_vm4 = vweird.f32 %v750_v25 }
 0x184   : > { %1178 = vrsqrt.f32 %v733_v24  ;;  %vm774_vm5 = vweird.f32 %v767_v26  ;;  %vm791_vm6 = vweird.f32 %v1785_v27  ;;  %vm808_vm7 = vweird.f32 %v1787_v28  ;;  %v732_v62 = vld [vmem:[#allocation9] sm:$0x1]  ;;  %v749_v3 = vld [vmem:[#allocation10] sm:$0x1]  ;;  %v766_v9 = vld [vmem:[#allocation11] sm:$0x1] }
 0x185   : > { %1180 = vrsqrt.f32 %v750_v25  ;;  %v783_v15 = vld [vmem:[#allocation12] sm:$0x1]  ;;  %v800_v22 = vld [vmem:[#allocation13] sm:$0x1] }
 0x186   : > { %1182 = vrsqrt.f32 %v767_v26 }
 0x187   : > { %1184 = vrsqrt.f32 %v1785_v27 }
 0x188   : > { %v1789_v29 = vld [vmem:[#allocation8] sm:$0x1]  ;;  %1186 = vrsqrt.f32 %v1787_v28 }
 0x189   : > { %v1793_v30 = vpop.eup %1176  ;;  %1188 = vrsqrt.f32 %v1789_v29  ;;  %vm825_vm8 = vweird.f32 %v1789_v29 }
 0x18a   : > { %v1179_v31 = vpop.eup %1178  ;;  %v723_v32 = vmul.f32 %v1793_v30, %v721_v23  ;;  %vm729_vm9 = vweird.f32 %v1793_v30 }
 0x18b   : > { %v1797_v33 = vpop.eup %1180  ;;  %v735_v34 = vmul.f32 %v1179_v31, %v733_v24  ;;  %vm741_vm10 = vweird.f32 %v1179_v31  ;;  %vm1828_vm13 = vmor %vm728_vm2, %vm729_vm9 }
 0x18c   : > { %v1800_v35 = vpop.eup %1182  ;;  %v724_v36 = vmul.f32 %v1793_v30, %v723_v32  ;;  %v752_v37 = vmul.f32 %v1797_v33, %v750_v25  ;;  %vm758_vm11 = vweird.f32 %v1797_v33  ;;  %vm1836_vm15 = vmor %vm740_vm3, %vm741_vm10 }
 0x18d   : > { %v1806_v38 = vpop.eup %1184  ;;  %v736_v39 = vmul.f32 %v1179_v31, %v735_v34  ;;  %v769_v40 = vmul.f32 %v1800_v35, %v767_v26  ;;  %vm775_vm12 = vweird.f32 %v1800_v35  ;;  %vm1846_vm2 = vmor %vm757_vm4, %vm758_vm11 }
 0x18e   : > { %v1810_v41 = vpop.eup %1186  ;;  %v725_v42 = vmul.f32 0.5, %v724_v36  ;;  %v753_v43 = vmul.f32 %v1797_v33, %v752_v37  ;;  %v786_v44 = vmul.f32 %v1806_v38, %v1785_v27  ;;  %vm792_vm14 = vweird.f32 %v1806_v38  ;;  %vm1854_vm3 = vmor %vm774_vm5, %vm775_vm12  ;;  %v817_v27 = vld [vmem:[#allocation14] sm:$0x1] }
 0x18f   : > { %v1816_v45 = vpop.eup %1188  ;;  %v737_v46 = vmul.f32 0.5, %v736_v39  ;;  %v770_v47 = vmul.f32 %v1800_v35, %v769_v40  ;;  %v803_v48 = vmul.f32 %v1810_v41, %v1787_v28  ;;  %vm809_vm0 = vweird.f32 %v1810_v41  ;;  %vm1866_vm4 = vmor %vm791_vm6, %vm792_vm14 }
 0x190   : > { %v726_v49 = vsub.f32 1.5, %v725_v42  ;;  %v754_v50 = vmul.f32 0.5, %v753_v43  ;;  %v787_v51 = vmul.f32 %v1806_v38, %v786_v44  ;;  %v820_v52 = vmul.f32 %v1816_v45, %v1789_v29  ;;  %vm1878_vm5 = vmor %vm808_vm7, %vm809_vm0 }
 0x191   : > { %v738_v54 = vsub.f32 1.5, %v737_v46  ;;  %v771_v55 = vmul.f32 0.5, %v770_v47  ;;  %v804_v56 = vmul.f32 %v1810_v41, %v803_v48  ;;  %vm826_vm9 = vweird.f32 %v1816_v45 }
 0x192   : > { %v755_v58 = vsub.f32 1.5, %v754_v50  ;;  %v788_v59 = vmul.f32 0.5, %v787_v51  ;;  %v821_v60 = vmul.f32 %v1816_v45, %v820_v52  ;;  %v727_v61 = vmul.f32 %v1793_v30, %v726_v49  ;;  %vm827_vm6 = vmor %vm825_vm8, %vm826_vm9 }
 0x193   : > { %v739_v63 = vmul.f32 %v1179_v31, %v738_v54  ;;  %v772_v1 = vsub.f32 1.5, %v771_v55  ;;  %v805_v2 = vmul.f32 0.5, %v804_v56 }
 0x194   : > { %v756_v4 = vmul.f32 %v1797_v33, %v755_v58  ;;  %v789_v6 = vsub.f32 1.5, %v788_v59  ;;  %v822_v7 = vmul.f32 0.5, %v821_v60  ;;  %v731_v19 = vsel %vm1828_vm13, %v1793_v30, %v727_v61 }
 0x195   : > { %v743_v8 = vsel %vm1836_vm15, %v1179_v31, %v739_v63  ;;  %v773_v10 = vmul.f32 %v1800_v35, %v772_v1  ;;  %v806_v12 = vsub.f32 1.5, %v805_v2 }
 0x196   : > { %v744_v13 = vmul.f32 %v743_v8, %v732_v62  ;;  %v760_v14 = vsel %vm1846_vm2, %v1797_v33, %v756_v4  ;;  %v790_v16 = vmul.f32 %v1806_v38, %v789_v6  ;;  %v823_v18 = vsub.f32 1.5, %v822_v7 }
 0x197   : > { %v761_v20 = vmul.f32 %v760_v14, %v749_v3  ;;  %v777_v21 = vsel %vm1854_vm3, %v1800_v35, %v773_v10  ;;  %v807_v23 = vmul.f32 %v1810_v41, %v806_v12 }
 0x198   : > { %v745_v24 = vmul.f32 %v744_v13, %v731_v19  ;;  %v778_v25 = vmul.f32 %v777_v21, %v766_v9  ;;  %v794_v26 = vsel %vm1866_vm4, %v1806_v38, %v790_v16  ;;  %v824_v28 = vmul.f32 %v1816_v45, %v823_v18 }
 0x199   : > { %v762_v30 = vmul.f32 %v761_v20, %v731_v19  ;;  %v795_v31 = vmul.f32 %v794_v26, %v783_v15  ;;  %v811_v32 = vsel %vm1878_vm5, %v1810_v41, %v807_v23 }
 0x19a   : > { %v746_v33 = vmul.f32 1.442695, %v745_v24  ;;  %v779_v34 = vmul.f32 %v778_v25, %v731_v19  ;;  %v812_v35 = vmul.f32 %v811_v32, %v800_v22  ;;  %v828_v29 = vsel %vm827_vm6, %v1816_v45, %v824_v28 }
 0x19b   : > { %v763_v36 = vmul.f32 1.442695, %v762_v30  ;;  %v796_v37 = vmul.f32 %v795_v31, %v731_v19  ;;  %v829_v39 = vmul.f32 %v828_v29, %v817_v27 }
 0x19c   : > { %1190 = vpow2.f32 %v746_v33  ;;  %v780_v40 = vmul.f32 1.442695, %v779_v34  ;;  %v813_v38 = vmul.f32 %v812_v35, %v731_v19 }
 0x19d   : > { %1192 = vpow2.f32 %v763_v36  ;;  %v797_v42 = vmul.f32 1.442695, %v796_v37  ;;  %v830_v43 = vmul.f32 %v829_v39, %v731_v19 }
 0x19e   : > { %1194 = vpow2.f32 %v780_v40  ;;  %v814_v44 = vmul.f32 1.442695, %v813_v38 }
 0x19f   : > { %1196 = vpow2.f32 %v797_v42  ;;  %v831_v46 = vmul.f32 1.442695, %v830_v43 }
 0x1a0   : > { %1198 = vpow2.f32 %v814_v44 }
 0x1a1   : > { %1200 = vpow2.f32 %v831_v46 }
 0x1a2   : > { %v1191_v41 = vpop.eup %1190 }
 0x1a3   : > { %v1193_v47 = vpop.eup %1192 }
 0x1a4   : > { %v1195_v48 = vpop.eup %1194  ;;  %v765_v52 = vadd.f32 %v1193_v47, %v1191_v41 }
 0x1a5   : > { %v1197_v49 = vpop.eup %1196 }
 0x1a6   : > { %v1199_v45 = vpop.eup %1198  ;;  %v799_v50 = vadd.f32 %v1197_v49, %v1195_v48 }
 0x1a7   : > { %v1201_v51 = vpop.eup %1200 }
 0x1a8   : > { %v816_v53 = vadd.f32 %v1199_v45, %v799_v50 }
 0x1aa   : > { %v833_v54 = vadd.f32 %v1201_v51, %v816_v53 }
 0x1ac   : > { %v834_v55 = vadd.f32 %v833_v54, %v765_v52 }
 0x1ae   : > { %1202 = vrcp.f32 %v834_v55  ;;  %v846_v58 = vand.u32 2147483648, %v834_v55  ;;  %vm840_vm7 = vweird.f32 %v834_v55  ;;  %v844_v60 = vand.u32 2147483647, %v834_v55 }
 0x1b0   : > { %v847_v62 = vor.u32 1.1754944e-38, %v846_v58  ;;  %vm845_vm11 = vcmp.eq.f32.partialorder %v844_v60, 8.507059e+37 }
 0x1b4   : > { %v1203_v56 = vpop.eup %1202 }
 0x1b5   : > { %v836_v57 = vmul.f32 %v1203_v56, %v834_v55  ;;  %vm841_vm8 = vweird.f32 %v1203_v56 }
 0x1b6   : > { %vm842_vm10 = vmor %vm840_vm7, %vm841_vm8 }
 0x1b7   : > { %v837_v59 = vsub.f32 1.0, %v836_v57 }
 0x1b9   : > { %v838_v61 = vmul.f32 %v1203_v56, %v837_v59 }
 0x1bb   : > { %v839_v63 = vadd.f32 %v1203_v56, %v838_v61 }
 0x1bd   : > { %v843_v0 = vsel %vm842_vm10, %v1203_v56, %v839_v63 }
 0x1be   : > { %v848_v1 = vsel %vm845_vm11, %v847_v62, %v843_v0 }
 0x1bf   : > { %v849_v2 = vmul.f32 %v848_v1, %v765_v52 }
 0x1c1   : > { %1204 = vlog2.f32 %v849_v2 }
 0x1c7   : > { %v1205_v3 = vpop.eup %1204 }
 0x1c8   : > { %v851_v4 = vmul.f32 0.6931472, %v1205_v3 }
 0x1ca   : > { %v852_v5 = vsub.f32 0.0, %v851_v4 }
 0x1cc   : > { %853 = vst.msk [vmem:[#allocation27] sm:$0x1] %vm541_vm1, %v852_v5 }
 0x1cd PF: > { %p1140_p10 = scmp.eq.s32.totalorder %s1557_s28, 1  ;;  %s1497_s8 = smov [#allocation27]  }
 0x1ce   : > { %s860_s23 = sshll.u32 %s1497_s8, 4  ;;  %s862_s27 = sshll.u32 %s1926_s7, 4  ;;  %s861_s23 = int_to_ptr.vmem [resolvable:$true] %s860_s23  ;;  %s863_s27 = int_to_ptr.hbm [resolvable:$true] %s862_s27 }
 0x1cf   : > { %1114 = dma.vmem_to_hbm [thread:$0]  (%p1140_p10), %s861_s23, 16, %s863_s27, [#allocation17]  }
 0x1d0   : > { %1477 = dma.done.wait (%p1140_p10), [#allocation17], 16  }
 0x1d1   : > { %1479 = vsyncadd (%p1140_p10), [#allocation17], 4294967280 }
 0x1d2 PF: > { %s1956_s19 = sld [smem:[#allocation33_spill]]  ;;  %p27_p5 = scmp.ge.s32.totalorder %s1560_s29, 4  }
 0x1d3   : > { %s1957_s24 = smov %s1486_s25  ;;  %s1958_s25 = smov %s1490_s26 }
 0x1d4   : > { %s1960_s27 = smov %s1560_s29  ;;  %29 = sbr.rel (!%p27_p5) target bundleno = 13 (0xd), region = 165 }
 0x1d8   : > { %s1959_s26 = smov %s1956_s19 }
 0x1d9   :  { %876 = vsyncpa [#allocation16], 1 }
 0x1da   :  { %878 = vsyncpa [#allocation16 + $0x1], 1 }
 0x1db   :  { %879 = vsyncpa [#allocation19], 1 }
 0x1dc   :  { %881 = vsyncpa [#allocation19 + $0x1], 1 }
 0x1dd   :  { %882 = vsyncpa [#allocation22], 1 }
 0x1de   :  { %884 = vsyncpa [#allocation22 + $0x1], 1 }
 0x1df   :  { %885 = vsyncpa [#allocation25], 1 }
 0x1e0   :  { %887 = vsyncpa [#allocation25 + $0x1], 1 }
 0x1e1   :  { %888 = vsyncpa [#allocation17], 1 }
 0x1e2   :  { %890 = vsyncpa [#allocation17 + $0x1], 1 }

</bundles_post_ra>
